<compile_context>
chip_gen: v7x
topology: tpu7x:2x2x1
jax: 0.10.0
libtpu: 0.0.40
codegen_flags: <defaults>
</compile_context>

<pallas_src>
import jax
import jax.numpy as jnp
from jax.experimental import pallas as pl
from jax.experimental.pallas import tpu as pltpu


def _pick_s_tile(S):
    """Largest convenient S tile: 512/256/128 if it divides S, else full extent."""
    for t in (512, 256, 128):
        if S % t == 0:
            return t
    return S


# --------------------------------------------------------------------------
# Pallas kernel 1: pairwise squared distance  dist[b, s, n] = ||q_s - p_n||^2
# Pure VPU: per-coordinate broadcast-subtract-square over lane-dense [tS, N].
# --------------------------------------------------------------------------
def _dist_kernel(p_ref, q_ref, o_ref):
    p = p_ref[0]                               # [3, N]   (N lane-dense)
    q = q_ref[0]                               # [tS, 3]
    d = None
    for c in range(q.shape[1]):                # unrolled over the 3 coordinates
        diff = q[:, c:c + 1] - p[c:c + 1, :]   # [tS, 1] - [1, N] -> [tS, N]
        sq = diff * diff
        d = sq if d is None else d + sq
    o_ref[0] = d


def pairwise_dist_sq(points_cf, query_cl):
    """points_cf [B,3,N] (channels-first), query_cl [B,S,3] -> ||q-p||^2 [B,S,N]."""
    B, C, N = points_cf.shape
    _, S, _ = query_cl.shape
    tS = _pick_s_tile(S)
    return pl.pallas_call(
        _dist_kernel,
        out_shape=jax.ShapeDtypeStruct((B, S, N), jnp.float32),
        grid=(B, S // tS),
        in_specs=[pl.BlockSpec((1, C, N), lambda b, s: (b, 0, 0)),
                  pl.BlockSpec((1, tS, C), lambda b, s: (b, s, 0))],
        out_specs=pl.BlockSpec((1, tS, N), lambda b, s: (b, s, 0)),
        compiler_params=pltpu.CompilerParams(
            dimension_semantics=("parallel", "parallel")),
    )(points_cf, query_cl)


# --------------------------------------------------------------------------
# Pallas kernel 2: fused per-scale PointNet MLP (1x1 conv + folded BN + ReLU)*L
# followed by max-pool over the K neighbor axis, emitted channels-first.
# --------------------------------------------------------------------------
def _make_mlp_kernel(layer_dims, tS, K):
    cin0 = layer_dims[0][0]
    cout_last = layer_dims[-1][1]

    def kernel(g_ref, w_ref, aff_ref, o_ref):
        x = g_ref[0].reshape(tS * K, cin0)             # bf16 activations, rows=(s,k)
        for l, (cin, cout) in enumerate(layer_dims):
            w = w_ref[l][:cin, :cout]                  # bf16 [cin, cout]
            aff = aff_ref[l]                           # f32 [2, Cmax_out]
            scale = aff[0:1, :cout]                    # [1, cout]
            shift = aff[1:2, :cout]
            y = jnp.dot(x.astype(jnp.bfloat16), w,
                        preferred_element_type=jnp.float32)
            x = jnp.maximum(y * scale + shift, 0.0)    # folded BN (eval) + ReLU, f32
        pooled = jnp.max(x.reshape(tS, K, cout_last), axis=1)   # [tS, Cout]
        o_ref[0] = jnp.transpose(pooled, (1, 0))                 # [Cout, tS] lane-dense
    return kernel


def msg_mlp_maxpool(grouped, w_slab, aff_slab, layer_dims):
    """grouped [B,S,K,Cin] (bf16) -> [B, Cout_last, S] (f32, channels-first)."""
    B, S, K, Cin = grouped.shape
    L, Cmax_in, Cmax_out = w_slab.shape
    Cout = layer_dims[-1][1]
    tS = _pick_s_tile(S)
    return pl.pallas_call(
        _make_mlp_kernel(layer_dims, tS, K),
        out_shape=jax.ShapeDtypeStruct((B, Cout, S), jnp.float32),
        grid=(B, S // tS),
        in_specs=[
            pl.BlockSpec((1, tS, K, Cin), lambda b, s: (b, s, 0, 0)),
            pl.BlockSpec((L, Cmax_in, Cmax_out), lambda b, s: (0, 0, 0)),
            pl.BlockSpec((L, 2, Cmax_out), lambda b, s: (0, 0, 0)),
        ],
        out_specs=pl.BlockSpec((1, Cout, tS), lambda b, s: (b, 0, s)),
        compiler_params=pltpu.CompilerParams(
            dimension_semantics=("parallel", "parallel")),
    )(grouped, w_slab, aff_slab)


# --------------------------------------------------------------------------
# Plain-JAX glue (data-dependent gather / sort / sequential FPS loop)
# --------------------------------------------------------------------------
def index_points(points, idx):
    """points [B,N,C], idx [B,...] -> [B,...,C] (same as reference index_points)."""
    return jax.vmap(lambda p, i: p[i])(points, idx)


def farthest_point_sample(points_xyz, n_point, key):
    """Reproduces reference FPS, including the int64-`distance` truncation quirk."""
    B, N, _ = points_xyz.shape
    farthest = jax.random.randint(key, (B,), 0, N).astype(jnp.int32)
    distance = jnp.full((B, N), 1.0e10, jnp.float32)
    sample_idx = jnp.zeros((B, n_point), jnp.int32)

    def body(i, carry):
        sample_idx, distance, farthest = carry
        sample_idx = sample_idx.at[:, i].set(farthest)
        centroid = jax.vmap(lambda p, f: p[f])(points_xyz, farthest)[:, None, :]
        dist = jnp.sum((points_xyz - centroid) ** 2, axis=-1)
        # reference keeps `distance` as torch.long -> float assignment truncates
        distance = jnp.where(dist < distance, jnp.trunc(dist), distance)
        farthest = jnp.argmax(distance, axis=-1).astype(jnp.int32)
        return sample_idx, distance, farthest

    sample_idx, _, _ = jax.lax.fori_loop(
        0, n_point, body, (sample_idx, distance, farthest))
    return sample_idx


def radius_select(dist, radius, k):
    """Ball query from a precomputed [B,S,N] squared-distance matrix."""
    B, S, N = dist.shape
    nn_idx = jnp.broadcast_to(jnp.arange(N, dtype=jnp.int32), (B, S, N))
    nn_idx = jnp.where(dist > radius ** 2, N, nn_idx)
    nn_idx = jnp.sort(nn_idx, axis=-1)[:, :, :k]
    nn_nearest = jnp.broadcast_to(nn_idx[:, :, :1], (B, S, k))
    # NOTE: if a query had zero in-radius points every index stays == N and the
    # downstream gather clamps to N-1 (PyTorch would raise instead).
    nn_idx = jnp.where(nn_idx == N, nn_nearest, nn_idx)
    return nn_idx


# --------------------------------------------------------------------------
# Module
# --------------------------------------------------------------------------
class PointNetSetAbstractionMsg:
    def __init__(self, n_points, radius_list, nn_k_list, in_channel, mlp_list, key):
        self.n_point = n_points
        self.radius_list = radius_list
        self.nn_k_list = nn_k_list
        eps = 1e-5
        # TODO(synk): BatchNorm2d is folded in eval mode (running stats); the
        # training-mode batch-statistics path is not reproduced.
        self.w_slabs, self.aff_slabs, self.layer_dims = [], [], []
        for mlp in mlp_list:
            last = in_channel + 3
            ws, scs, shs, dims = [], [], [], []
            for out_ch in mlp:
                key, k1, k2, k3, k4, k5, k6 = jax.random.split(key, 7)
                w = jax.random.normal(k1, (last, out_ch), jnp.float32) / jnp.sqrt(float(last))
                b = 0.1 * jax.random.normal(k2, (out_ch,), jnp.float32)
                gamma = 1.0 + 0.1 * jax.random.normal(k3, (out_ch,), jnp.float32)
                beta = 0.1 * jax.random.normal(k4, (out_ch,), jnp.float32)
                mu = 0.1 * jax.random.normal(k5, (out_ch,), jnp.float32)
                var = 1.0 + 0.1 * jnp.abs(jax.random.normal(k6, (out_ch,), jnp.float32))
                scale = gamma / jnp.sqrt(var + eps)
                shift = (b - mu) * scale + beta
                ws.append(w); scs.append(scale); shs.append(shift)
                dims.append((last, out_ch))
                last = out_ch
            L = len(mlp)
            cmax_in = max(d[0] for d in dims)
            cmax_out = max(d[1] for d in dims)
            w_slab = jnp.zeros((L, cmax_in, cmax_out), jnp.float32)
            aff_slab = jnp.zeros((L, 2, cmax_out), jnp.float32)
            for l, (w, sc, sh) in enumerate(zip(ws, scs, shs)):
                w_slab = w_slab.at[l, :w.shape[0], :w.shape[1]].set(w)
                aff_slab = aff_slab.at[l, 0, :sc.shape[0]].set(sc)
                aff_slab = aff_slab.at[l, 1, :sh.shape[0]].set(sh)
            self.w_slabs.append(w_slab.astype(jnp.bfloat16))   # bf16 MXU weights
            self.aff_slabs.append(aff_slab)                     # f32 epilogue params
            self.layer_dims.append(tuple(dims))
        self.fps_key = key

    def __call__(self, points_xyz, points_features):
        """points_xyz [B,3,N], points_features [B,D,N] -> ([B,3,S], [B, sum(Cout), S])."""
        xyz = jnp.transpose(points_xyz, (0, 2, 1))                    # [B, N, 3]
        feat = None if points_features is None else jnp.transpose(points_features, (0, 2, 1))
        B, N, _ = xyz.shape
        S = self.n_point
        fps_idx = farthest_point_sample(xyz, S, self.fps_key)
        out_xyz = index_points(xyz, fps_idx)                          # [B, S, 3]

        # Pairwise squared distance: computed once, reused for every radius scale.
        dist = pairwise_dist_sq(points_xyz, out_xyz)                  # [B, S, N]

        x_list = []
        for i, (radius, k) in enumerate(zip(self.radius_list, self.nn_k_list)):
            nn_idx = radius_select(dist, radius, k)                   # [B, S, K]
            # TODO(synk): fuse this gather/concat into the MLP kernel via
            # scalar-prefetched nn_idx + manual DMA gather to avoid the HBM
            # round-trip of the grouped tensor at production sizes.
            grp_xyz = index_points(xyz, nn_idx) - out_xyz[:, :, None, :]
            if feat is not None:
                grouped = jnp.concatenate([grp_xyz, index_points(feat, nn_idx)], axis=-1)
            else:
                grouped = grp_xyz
            grouped = grouped.astype(jnp.bfloat16)                    # halve DMA bytes
            x = msg_mlp_maxpool(grouped, self.w_slabs[i], self.aff_slabs[i],
                                self.layer_dims[i])                   # [B, Cout_i, S]
            x_list.append(x)

        out_xyz_t = jnp.transpose(out_xyz, (0, 2, 1))                 # [B, 3, S]
        return out_xyz_t, jnp.concatenate(x_list, axis=1)


if __name__ == "__main__":
    key = jax.random.PRNGKey(0)
    k_xyz, k_feat, k_params = jax.random.split(key, 3)

    B, N, D = 2, 64, 3
    n_points = 16
    radius_list = [1.0, 2.0]
    nn_k_list = [8, 16]
    mlp_list = [[16, 32], [16, 64]]

    # coordinates spread over [0, 4)^3 so the reference FPS distance-truncation
    # quirk still yields non-degenerate sampling
    points_xyz = jax.random.uniform(k_xyz, (B, 3, N), jnp.float32) * 4.0
    points_features = jax.random.normal(k_feat, (B, D, N), jnp.float32)

    module = PointNetSetAbstractionMsg(n_points, radius_list, nn_k_list,
                                       in_channel=D, mlp_list=mlp_list, key=k_params)
    out_xyz, out_feat = module(points_xyz, points_features)
    out_xyz, out_feat = jax.block_until_ready((out_xyz, out_feat))

    assert out_xyz.shape == (B, 3, n_points)
    assert out_feat.shape == (B, sum(m[-1] for m in mlp_list), n_points)
    assert jnp.all(jnp.isfinite(out_xyz)) and jnp.all(jnp.isfinite(out_feat))
    print("KERNEL_OK")
</pallas_src>

<mosaic_0001>
module attributes {stable_mosaic.version = 11 : i64} {
  func.func @_dist_kernel(%arg0: i32, %arg1: i32, %arg2: memref<1x3x64xf32, #tpu.memory_space<vmem>>, %arg3: memref<1x16x3xf32, #tpu.memory_space<vmem>>, %arg4: memref<1x16x64xf32, #tpu.memory_space<vmem>>) attributes {dimension_semantics = [#tpu.dimension_semantics<parallel>, #tpu.dimension_semantics<parallel>], iteration_bounds = array<i64: 2, 1>, scalar_prefetch = 0 : i64, scratch_operands = 0 : i64, tpu.core_type = #tpu.core_type<tc>, window_params = [{transform_indices = @transform_0, window_bounds = array<i64: 1, 3, 64>}, {transform_indices = @transform_1, window_bounds = array<i64: 1, 16, 3>}, {transform_indices = @transform_2, window_bounds = array<i64: 1, 16, 64>}]} {
    %c0 = arith.constant 0 : index
    %c0_0 = arith.constant 0 : index
    %c0_1 = arith.constant 0 : index
    %0 = vector.load %arg2[%c0, %c0_0, %c0_1] : memref<1x3x64xf32, #tpu.memory_space<vmem>>, vector<1x3x64xf32>
    %1 = vector.shape_cast %0 : vector<1x3x64xf32> to vector<3x64xf32>
    %c0_2 = arith.constant 0 : index
    %c0_3 = arith.constant 0 : index
    %c0_4 = arith.constant 0 : index
    %2 = vector.load %arg3[%c0_2, %c0_3, %c0_4] : memref<1x16x3xf32, #tpu.memory_space<vmem>>, vector<1x16x3xf32>
    %3 = vector.shape_cast %2 : vector<1x16x3xf32> to vector<16x3xf32>
    %4 = vector.extract_strided_slice %3 {offsets = [0, 0], sizes = [16, 1], strides = [1, 1]} : vector<16x3xf32> to vector<16x1xf32>
    %5 = vector.extract_strided_slice %1 {offsets = [0, 0], sizes = [1, 64], strides = [1, 1]} : vector<3x64xf32> to vector<1x64xf32>
    %6 = vector.broadcast %4 : vector<16x1xf32> to vector<16x64xf32>
    %7 = vector.broadcast %5 : vector<1x64xf32> to vector<16x64xf32>
    %8 = arith.subf %6, %7 : vector<16x64xf32>
    %9 = arith.mulf %8, %8 : vector<16x64xf32>
    %10 = vector.extract_strided_slice %3 {offsets = [0, 1], sizes = [16, 1], strides = [1, 1]} : vector<16x3xf32> to vector<16x1xf32>
    %11 = vector.extract_strided_slice %1 {offsets = [1, 0], sizes = [1, 64], strides = [1, 1]} : vector<3x64xf32> to vector<1x64xf32>
    %12 = vector.broadcast %10 : vector<16x1xf32> to vector<16x64xf32>
    %13 = vector.broadcast %11 : vector<1x64xf32> to vector<16x64xf32>
    %14 = arith.subf %12, %13 : vector<16x64xf32>
    %15 = arith.mulf %14, %14 : vector<16x64xf32>
    %16 = arith.addf %9, %15 : vector<16x64xf32>
    %17 = vector.extract_strided_slice %3 {offsets = [0, 2], sizes = [16, 1], strides = [1, 1]} : vector<16x3xf32> to vector<16x1xf32>
    %18 = vector.extract_strided_slice %1 {offsets = [2, 0], sizes = [1, 64], strides = [1, 1]} : vector<3x64xf32> to vector<1x64xf32>
    %19 = vector.broadcast %17 : vector<16x1xf32> to vector<16x64xf32>
    %20 = vector.broadcast %18 : vector<1x64xf32> to vector<16x64xf32>
    %21 = arith.subf %19, %20 : vector<16x64xf32>
    %22 = arith.mulf %21, %21 : vector<16x64xf32>
    %23 = arith.addf %16, %22 : vector<16x64xf32>
    %c0_5 = arith.constant 0 : index
    %c0_6 = arith.constant 0 : index
    %c0_7 = arith.constant 0 : index
    %24 = vector.load %arg4[%c0_5, %c0_6, %c0_7] : memref<1x16x64xf32, #tpu.memory_space<vmem>>, vector<1x16x64xf32>
    %25 = vector.shape_cast %24 : vector<1x16x64xf32> to vector<16x64xf32>
    %26 = vector.shape_cast %23 : vector<16x64xf32> to vector<1x16x64xf32>
    tpu.vector_store %arg4[%c0_5, %c0_6, %c0_7], %26 {strides = array<i32>} : memref<1x16x64xf32, #tpu.memory_space<vmem>>, vector<1x16x64xf32>,
    return
  }
  func.func @transform_0(%arg0: i32, %arg1: i32) -> (i32, i32, i32) {
    %c0_i32 = arith.constant 0 : i32
    %c0_i32_0 = arith.constant 0 : i32
    %c0_i32_1 = arith.constant 0 : i32
    return %arg0, %c0_i32, %c0_i32_0 : i32, i32, i32
  }
  func.func @transform_1(%arg0: i32, %arg1: i32) -> (i32, i32, i32) {
    %c0_i32 = arith.constant 0 : i32
    %c0_i32_0 = arith.constant 0 : i32
    return %arg0, %arg1, %c0_i32 : i32, i32, i32
  }
  func.func @transform_2(%arg0: i32, %arg1: i32) -> (i32, i32, i32) {
    %c0_i32 = arith.constant 0 : i32
    %c0_i32_0 = arith.constant 0 : i32
    return %arg0, %arg1, %c0_i32 : i32, i32, i32
  }
}

</mosaic_0001>

<bundles_post_ra>
// kernel: tpu_custom_call.1
= control target key start
LH: loop header
LB: loop body
LE: loop exit
PB: predicated region body
PF: predicated region fallthrough
CT: control target
= control target key end

     0   :  { %7 = vsyncpa [#allocation3], 0  ;;  %s660_s0 = inlined_call_operand.vmem [shape: f32[2,3,64], index: 0, kind: input, shape index: {}]   ;;  %s661_s1 = inlined_call_operand.vmem [shape: f32[2,16,3], index: 1, kind: input, shape index: {}]   ;;  %s662_s2 = inlined_call_operand.hbm [shape: f32[2,16,64], index: 2, kind: output, shape index: {}]  }
   0x1   :  { %9 = vsyncpa [#allocation3 + $0x1], 0  ;;  %s538_s9 = smov 0   ;;  %s540_s10 = smov 0  }
   0x2   :  { %s542_s11 = smov 0   ;;  %s544_s12 = smov 0  }
   0x3   :  { %s546_s13 = smov 0   ;;  %s548_s14 = smov 0  }
   0x4 LB: > { %s357_s15 = sadd.s32 4294967295, %s515_s14   ;;  %s358_s16 = sadd.s32 4294967294, %s515_s14   ;;  %s515_s14 = sphi %s548_s14, %s15_s14   ;;  %s511_s13 = sphi %s546_s13, %s669_s13   ;;  %s507_s12 = sphi %s544_s12, %s668_s12   ;;  %s503_s11 = sphi %s542_s11, %s667_s11   ;;  %s499_s10 = sphi %s540_s10, %s666_s10   ;;  %s495_s9 = sphi %s538_s9, %s665_s9  }
   0x5   : > { %s27_s17 = sadd.s32 1, %s511_s13  ;;  %s90_s18 = sadd.s32 1, %s503_s11 }
   0x6   : > { %p29_p0 = scmp.ge.s32.totalorder %s27_s17, 2  ;;  %p100_p1 = scmp.ne.s32.totalorder %s503_s11, %s499_s10 }
   0x7   : > { %p101_p2 = scmp.eq.s32.totalorder %s357_s15, 1  ;;  %p106_p3 = scmp.ne.s32.totalorder %s499_s10, %s495_s9 }
   0x8   : > { %s671_s17 = smov (%p29_p0, %s27_s17), 0  ;;  %p107_p5 = scmp.eq.s32.totalorder %s358_s16, 1 }
   0x9   : > { %p578_p4 = por %p101_p2, %p100_p1  ;;  %s85_s20 = ssub.s32 %s511_s13, %s671_s17 }
   0xa   : > { %p361_p6 = scmp.ge.s32.totalorder %s515_s14, 1  ;;  %p88_p7 = scmp.eq.s32.totalorder %s85_s20, 0 }
   0xb   : > { %p585_p8 = por %p107_p5, %p106_p3  ;;  %p145_p9 = scmp.lt.s32.totalorder %s515_s14, 3 }
   0xc   : > { %s591_s22 = scalar_select %p88_p7, %s503_s11, %s90_s18  }
   0xd   : > { %p146_p10 = pnand %p361_p6, %p145_p9 }
   0xe   : > { %p175_p11 = scmp.lt.s32.totalorder (!%p146_p10), %s507_s12, 1  ;;  %v517_v0 = vmov (!%p146_p10), 1   ;;  %v518_v1 = vmov (!%p146_p10), 0   ;;  %v519_v4 = vmov (!%p146_p10), 2   ;;  %v203_v5 = vlaneseq (!%p146_p10)  ;;  %s172_s4 = sand.u32 (!%p146_p10), 1, %s499_s10  }
   0xf   : > { %149 = sbr.rel (%p146_p10) target bundleno = 185 (0xb9), region = 28  ;;  %434 = vset.pattern.permute.xlu1 (!%p146_p10), %v517_v0  ;;  %433 = vset.pattern.permute.xlu0 (!%p146_p10), %v518_v1  ;;  %s362_s5 = sshll.u32 (!%p146_p10), %s172_s4, 4  ;;  %vm247_vm0 = vcmask (!%p146_p10), 523264  }
  0x10   : > { %v204_v6 = vshrl.u32 (!%p146_p10), %v203_v5, 7  ;;  %s372_s6 = sshll.u32 (!%p146_p10), %s507_s12, 8  ;;  %s174_s7 = scalar_lea.vmem (!%p146_p10), [#allocation2], %s362_s5 }
  0x11   : > { %s266_s8 = sshll.u32 (!%p146_p10), %s174_s7, 4  ;;  %s608_s18 = scalar_lea.hbm (!%p146_p10), %s662_s2, %s372_s6  ;;  %s610_s8 = int_to_ptr.vmem [resolvable:$true] %s266_s8 }
  0x12   : > { %v221_v7 = vsub.s32 (!%p146_p10), 1, %v204_v6  ;;  %v205_v8 = vsub.s32 (!%p146_p10), 0, %v204_v6  ;;  %v239_v14 = vsub.s32 (!%p146_p10), 2, %v204_v6  ;;  %s437_s20 = scalar_lea.vmem (!%p146_p10), %s610_s8, 256 }
  0x13   : > { %p438_p12 = scmp.ne.s32.totalorder (!%p146_p10), %s610_s8, %s437_s20 }
  0x15   : > { %p439_p13 = pnand (!%p146_p10), %p438_p12, %p578_p4 }
  0x16   : > { %s176_s23 = scalar_select %p175_p11, %s507_s12, 1 }
  0x17   : > { %s614_s12 = scalar_lea.sflag [#allocation3], %s172_s4  ;;  %p440_p0 = pneg %p439_p13 }
  0x18   : > { %s371_s24 = sshll.u32 %s176_s23, 4  ;;  %s363_s28 = sshll.u32 %s176_s23, 2 }
  0x19   : > { %s187_s27 = scalar_lea.vmem %s661_s1, %s371_s24  ;;  %s178_s3 = scalar_lea.vmem %s660_s0, %s363_s28 }
  0x1a   : > { %v191_v2 = vld [vmem:[%s187_s27] sm:$0xff]  ;;  %v192_v3 = vld [vmem:[%s187_s27 + $0x8] sm:$0xff]  ;;  %s520_s23 = smov [#allocation2]  }
  0x1b   : > { %212 = vperm.xlu1 %434, %v191_v2   ;;  %195 = vperm.xlu0 %433, %v191_v2   ;;  %v190_v9 = vld [vmem:[%s178_s3] sm:$0x7]  ;;  %s441_s24 = sshll.u32 %s520_s23, 4  ;;  %s442_s24 = int_to_ptr.vmem [resolvable:$false] %s441_s24 }
  0x1c   : > { %v222_v11 = vrot.slane %v190_v9, %v221_v7  ;;  %v206_v13 = vrot.slane %v190_v9, %v205_v8  ;;  %v240_v21 = vrot.slane %v190_v9, %v239_v14  ;;  %s443_s25 = scalar_lea.vmem %s442_s24, 512  ;;  %p444_p1 = scmp.lt.s32.totalorder %s610_s8, %s442_s24 }
  0x1d   : > { %p445_p2 = scmp.lt.s32.totalorder %s443_s25, %s437_s20 }
  0x1f   : > { %216 = vperm.xlu1 %434, %v192_v3   ;;  %200 = vperm.xlu0 %433, %v192_v3   ;;  %p446_p3 = por %p445_p2, %p444_p1 }
  0x21   : > { %p447_p5 = pnand %p446_p3, %p440_p0 }
  0x23   : > { %436 = vset.pattern.permute.xlu1 %v519_v4  ;;  %435 = vset.pattern.permute.xlu0 %v519_v4 }
  0x24   : > { %234 = vperm.xlu1 %436, %v192_v3   ;;  %230 = vperm.xlu0 %435, %v191_v2  }
  0x9a   : > { %v213_v10 = vpop.permute.xlu1 %212  ;;  %v196_v12 = vpop.permute.xlu0 %195 }
  0x9b   : > { %v223_v15 = vsub.f32 %v213_v10, %v222_v11  ;;  %v207_v16 = vsub.f32 %v196_v12, %v206_v13 }
  0x9d   : > { %v225_v22 = vmul.f32 %v223_v15, %v223_v15  ;;  %v209_v23 = vmul.f32 %v207_v16, %v207_v16 }
  0x9e   : > { %v217_v17 = vpop.permute.xlu1 %216  ;;  %v201_v18 = vpop.permute.xlu0 %200 }
  0x9f   : > { %v224_v19 = vsub.f32 %v217_v17, %v222_v11  ;;  %v208_v20 = vsub.f32 %v201_v18, %v206_v13  ;;  %v227_v30 = vadd.f32 %v225_v22, %v209_v23 }
  0xa1   : > { %v226_v24 = vmul.f32 %v224_v19, %v224_v19  ;;  %v210_v25 = vmul.f32 %v208_v20, %v208_v20 }
  0xa3   : > { %v235_v26 = vpop.permute.xlu1 %234  ;;  %v231_v27 = vpop.permute.xlu0 %230  ;;  %v228_v31 = vadd.f32 %v226_v24, %v210_v25 }
  0xa4   : > { %v242_v28 = vsub.f32 %v235_v26, %v240_v21  ;;  %v241_v29 = vsub.f32 %v231_v27, %v240_v21 }
  0xa6   : > { %v244_v32 = vmul.f32 %v242_v28, %v242_v28  ;;  %v243_v33 = vmul.f32 %v241_v29, %v241_v29 }
  0xa8   : > { %v246_v34 = vadd.f32 %v244_v32, %v228_v31  ;;  %v245_v35 = vadd.f32 %v243_v33, %v227_v30 }
  0xaa   : > { %249 = vst.msk [vmem:[%s174_s7 + $0x8] sm:$0xff] %vm247_vm0, %v246_v34  ;;  %248 = vst.msk [vmem:[%s174_s7] sm:$0xff] %vm247_vm0, %v245_v35 }
  0xab   : > { %450 = shalt.err (!%p447_p5)
}
  0xac   : > { %s451_s26 = scalar_lea.hbm %s608_s18, 256  ;;  %s455_s29 = scalar_lea.hbm %s662_s2, 512 }
  0xad   : > { %p452_p6 = scmp.ne.s32.totalorder %s608_s18, %s451_s26  ;;  %p456_p10 = scmp.lt.u32.totalorder %s608_s18, %s662_s2 }
  0xae   : > { %p457_p11 = scmp.lt.u32.totalorder %s455_s29, %s451_s26  ;;  %p459_p13 = scmp.lt.u32.totalorder %s451_s26, %s608_s18 }
  0xaf   : > { %p453_p7 = pnand %p452_p6, %p578_p4 }
  0xb0   : > { %p458_p12 = por %p457_p11, %p456_p10 }
  0xb1   : > { %p454_p9 = pneg %p453_p7 }
  0xb2   : > { %p460_p0 = por %p459_p13, %p458_p12 }
  0xb4   : > { %p461_p1 = pnand %p460_p0, %p454_p9 }
  0xb6   : > { %464 = shalt.err (!%p461_p1)
}
  0xb7   : > { %s521_s4 = smov 128   ;;  %s522_s5 = smov 8  }
  0xb8   : > { %373 = dma.vmem_to_hbm [thread:$0]  (%p578_p4), %s610_s8, 256, %s608_s18, %s614_s12, %s521_s4, %s521_s4, %s522_s5  }
  0xb9 PF: > { %p379_p2 = scmp.ge.s32.totalorder %s515_s14, 2  ;;  %s281_s6 = sand.u32 1, %s495_s9  }
  0xba   : > { %s282_s7 = scalar_lea.sflag [#allocation3], %s281_s6 }
  0xbb   : > { %p376_p3 = pnand %p379_p2, %p585_p8 }
  0xbd   : > { %490 = dma.done.wait (!%p376_p3), %s282_s7, 256  }
  0xbe   : > { %492 = vsyncadd (!%p376_p3), %s282_s7, 4294967040  ;;  %s15_s14 = sadd.s32 1, %s515_s14   ;;  %s665_s9 = smov %s499_s10 }
  0xbf   : > { %p12_p5 = scmp.ge.s32.totalorder %s15_s14, 4   ;;  %s666_s10 = smov %s503_s11 }
  0xc0   : > { %s667_s11 = smov %s591_s22  ;;  %s668_s12 = smov %s511_s13 }
  0xc1   : > { %s669_s13 = smov %s671_s17  ;;  %14 = sbr.rel (!%p12_p5) target bundleno = 4 (0x4), region = 66 }
  0xc8   :  { %287 = vsyncpa [#allocation3], 1 }
  0xc9   :  { %289 = vsyncpa [#allocation3 + $0x1], 1 }

</bundles_post_ra>
